<compile_context>
chip_gen: v7x
topology: tpu7x:2x2x1
jax: 0.10.0
libtpu: 0.0.40
codegen_flags: <defaults>
</compile_context>

<pallas_src>
import functools

import jax
import jax.numpy as jnp
from jax.experimental import pallas as pl
from jax.experimental.pallas import tpu as pltpu


def _round_up(n, m):
    return ((n + m - 1) // m) * m


def _logreg_kernel(x_ref, w_ref, b_ref, o_ref):
    # x_ref: (F, TR, 128) VMEM f32 | w_ref: (F,) SMEM | b_ref: (1,) SMEM | o_ref: (TR, 128) VMEM
    n_feature = x_ref.shape[0]                       # static
    acc = x_ref[0] * w_ref[0]                        # (TR, 128) dense vreg planes, VPU only
    for j in range(1, n_feature):                    # static unroll (F = 9)
        acc = acc + x_ref[j] * w_ref[j]
    # Reference semantics: sum_j(x*w + b) == x.w + F*b  (bias hoisted out of the reduction).
    logit = acc + b_ref[0] * jnp.float32(n_feature)
    o_ref[...] = jax.nn.sigmoid(logit).astype(o_ref.dtype)   # dense sublane+lane store


@functools.partial(jax.jit, static_argnames=("tile_batch",))
def logistic_regression(x, weight, bias, *, tile_batch=131072):
    """x: (B, F) f32; weight: (F,) f32; bias: (1,) f32  ->  (B,) f32."""
    B, F = x.shape
    B_pad = _round_up(B, 128)          # pad only to one lane-row; no pad-to-tile-multiple copy
    R = B_pad // 128                   # batch rows of 128 lanes each

    # Tile selection: TR rows (= TR*128 batch elements) per grid step.
    TR_cap = max(8, tile_batch // 128)           # default 1024 rows ~= 10 MiB double-buffered
    if R < 16:
        TR = R                                   # single exact block (legal: equals full dim)
    elif R <= TR_cap:
        TR = _round_up((R + 1) // 2, 8)          # >=2 tiles so both v7x TCs get work
    else:
        TR = TR_cap
    grid = ((R + TR - 1) // TR,)

    # Layout plumbing: feature-major, batch split as (R, 128) -> fully dense VMEM tiles.
    xT = jnp.transpose(x).astype(jnp.float32)                 # (F, B)  -- see TODO(synk) above
    if B_pad != B:
        xT = jnp.pad(xT, ((0, 0), (0, B_pad - B)))            # <=127 cols; no-op if B%128==0
    x3 = xT.reshape(F, R, 128)                                 # free row-major split
    w = weight.astype(jnp.float32).reshape(F)
    b = bias.astype(jnp.float32).reshape(1)

    out = pl.pallas_call(
        _logreg_kernel,
        out_shape=jax.ShapeDtypeStruct((R, 128), jnp.float32),
        grid_spec=pltpu.PrefetchScalarGridSpec(
            num_scalar_prefetch=0,
            grid=grid,
            in_specs=[
                pl.BlockSpec((F, TR, 128), lambda i: (0, i, 0)),     # x tile, pipelined DMA
                pl.BlockSpec(memory_space=pltpu.MemorySpace.SMEM),   # weight (F,) scalars
                pl.BlockSpec(memory_space=pltpu.MemorySpace.SMEM),   # bias (1,) scalar
            ],
            out_specs=pl.BlockSpec((TR, 128), lambda i: (i, 0)),     # dense output tile
        ),
        compiler_params=pltpu.CompilerParams(
            dimension_semantics=("parallel",),        # independent batch tiles (v7x megacore)
            vmem_limit_bytes=32 * 1024 * 1024,        # v5e default scoped limit is 16 MiB
        ),
        cost_estimate=pl.CostEstimate(
            flops=2 * B * F + B,
            transcendentals=B,
            bytes_accessed=B * F * 4 + B * 4 + F * 4 + 4,
        ),
    )(x3, w, b)
    return out.reshape(-1)[:B]


def reference(x, weight, bias):
    return jax.nn.sigmoid(jnp.sum(x * weight + bias, axis=1))


if __name__ == "__main__":
    n_feature = 9
    key = jax.random.PRNGKey(0)
    k_w, k_b, k_x = jax.random.split(key, 3)
    # Deterministic "randn"-style parameter init (matches torch.randn shapes).
    weight = jax.random.normal(k_w, (n_feature,), dtype=jnp.float32)
    bias = jax.random.normal(k_b, (1,), dtype=jnp.float32)

    # Primary small case matching the module spec.
    batch = 8
    x = jax.random.normal(k_x, (batch, n_feature), dtype=jnp.float32)
    y = logistic_regression(x, weight, bias)
    jax.block_until_ready(y)
    y_ref = reference(x, weight, bias)
    assert y.shape == (batch,)
    assert jnp.allclose(y, y_ref, atol=1e-5, rtol=1e-5), (y, y_ref)

    # Extra checks: ragged batch (pad+slice path) and multi-tile grid path.
    for extra_batch in (300, 4096):
        xe = jax.random.normal(jax.random.fold_in(k_x, extra_batch),
                               (extra_batch, n_feature), dtype=jnp.float32)
        ye = logistic_regression(xe, weight, bias)
        jax.block_until_ready(ye)
        assert ye.shape == (extra_batch,)
        assert jnp.allclose(ye, reference(xe, weight, bias), atol=1e-5, rtol=1e-5)

    print("KERNEL_OK")
</pallas_src>

<mosaic_0001>
module attributes {stable_mosaic.version = 11 : i64} {
  func.func @_logreg_kernel(%arg0: i32, %arg1: memref<9x1x128xf32, #tpu.memory_space<vmem>>, %arg2: memref<9xf32, #tpu.memory_space<smem>>, %arg3: memref<1xf32, #tpu.memory_space<smem>>, %arg4: memref<1x128xf32, #tpu.memory_space<vmem>>) attributes {dimension_semantics = [#tpu.dimension_semantics<parallel>], iteration_bounds = array<i64: 1>, scalar_prefetch = 0 : i64, scratch_operands = 0 : i64, tpu.core_type = #tpu.core_type<tc>, window_params = [{transform_indices = @transform_0, window_bounds = array<i64: 9, 1, 128>}, {transform_indices = @transform_1, window_bounds = array<i64: 9>}, {transform_indices = @transform_2, window_bounds = array<i64: 1>}, {transform_indices = @transform_3, window_bounds = array<i64: 1, 128>}]} {
    %c0 = arith.constant 0 : index
    %c0_0 = arith.constant 0 : index
    %c0_1 = arith.constant 0 : index
    %0 = vector.load %arg1[%c0, %c0_0, %c0_1] : memref<9x1x128xf32, #tpu.memory_space<vmem>>, vector<1x1x128xf32>
    %1 = vector.shape_cast %0 : vector<1x1x128xf32> to vector<1x128xf32>
    %c0_2 = arith.constant 0 : index
    %2 = memref.load %arg2[%c0_2] : memref<9xf32, #tpu.memory_space<smem>>
    %3 = vector.broadcast %2 : f32 to vector<1x128xf32>
    %4 = arith.mulf %1, %3 : vector<1x128xf32>
    %c1 = arith.constant 1 : index
    %c0_3 = arith.constant 0 : index
    %c0_4 = arith.constant 0 : index
    %5 = vector.load %arg1[%c1, %c0_3, %c0_4] : memref<9x1x128xf32, #tpu.memory_space<vmem>>, vector<1x1x128xf32>
    %6 = vector.shape_cast %5 : vector<1x1x128xf32> to vector<1x128xf32>
    %c1_5 = arith.constant 1 : index
    %7 = memref.load %arg2[%c1_5] : memref<9xf32, #tpu.memory_space<smem>>
    %8 = vector.broadcast %7 : f32 to vector<1x128xf32>
    %9 = arith.mulf %6, %8 : vector<1x128xf32>
    %10 = arith.addf %4, %9 : vector<1x128xf32>
    %c2 = arith.constant 2 : index
    %c0_6 = arith.constant 0 : index
    %c0_7 = arith.constant 0 : index
    %11 = vector.load %arg1[%c2, %c0_6, %c0_7] : memref<9x1x128xf32, #tpu.memory_space<vmem>>, vector<1x1x128xf32>
    %12 = vector.shape_cast %11 : vector<1x1x128xf32> to vector<1x128xf32>
    %c2_8 = arith.constant 2 : index
    %13 = memref.load %arg2[%c2_8] : memref<9xf32, #tpu.memory_space<smem>>
    %14 = vector.broadcast %13 : f32 to vector<1x128xf32>
    %15 = arith.mulf %12, %14 : vector<1x128xf32>
    %16 = arith.addf %10, %15 : vector<1x128xf32>
    %c3 = arith.constant 3 : index
    %c0_9 = arith.constant 0 : index
    %c0_10 = arith.constant 0 : index
    %17 = vector.load %arg1[%c3, %c0_9, %c0_10] : memref<9x1x128xf32, #tpu.memory_space<vmem>>, vector<1x1x128xf32>
    %18 = vector.shape_cast %17 : vector<1x1x128xf32> to vector<1x128xf32>
    %c3_11 = arith.constant 3 : index
    %19 = memref.load %arg2[%c3_11] : memref<9xf32, #tpu.memory_space<smem>>
    %20 = vector.broadcast %19 : f32 to vector<1x128xf32>
    %21 = arith.mulf %18, %20 : vector<1x128xf32>
    %22 = arith.addf %16, %21 : vector<1x128xf32>
    %c4 = arith.constant 4 : index
    %c0_12 = arith.constant 0 : index
    %c0_13 = arith.constant 0 : index
    %23 = vector.load %arg1[%c4, %c0_12, %c0_13] : memref<9x1x128xf32, #tpu.memory_space<vmem>>, vector<1x1x128xf32>
    %24 = vector.shape_cast %23 : vector<1x1x128xf32> to vector<1x128xf32>
    %c4_14 = arith.constant 4 : index
    %25 = memref.load %arg2[%c4_14] : memref<9xf32, #tpu.memory_space<smem>>
    %26 = vector.broadcast %25 : f32 to vector<1x128xf32>
    %27 = arith.mulf %24, %26 : vector<1x128xf32>
    %28 = arith.addf %22, %27 : vector<1x128xf32>
    %c5 = arith.constant 5 : index
    %c0_15 = arith.constant 0 : index
    %c0_16 = arith.constant 0 : index
    %29 = vector.load %arg1[%c5, %c0_15, %c0_16] : memref<9x1x128xf32, #tpu.memory_space<vmem>>, vector<1x1x128xf32>
    %30 = vector.shape_cast %29 : vector<1x1x128xf32> to vector<1x128xf32>
    %c5_17 = arith.constant 5 : index
    %31 = memref.load %arg2[%c5_17] : memref<9xf32, #tpu.memory_space<smem>>
    %32 = vector.broadcast %31 : f32 to vector<1x128xf32>
    %33 = arith.mulf %30, %32 : vector<1x128xf32>
    %34 = arith.addf %28, %33 : vector<1x128xf32>
    %c6 = arith.constant 6 : index
    %c0_18 = arith.constant 0 : index
    %c0_19 = arith.constant 0 : index
    %35 = vector.load %arg1[%c6, %c0_18, %c0_19] : memref<9x1x128xf32, #tpu.memory_space<vmem>>, vector<1x1x128xf32>
    %36 = vector.shape_cast %35 : vector<1x1x128xf32> to vector<1x128xf32>
    %c6_20 = arith.constant 6 : index
    %37 = memref.load %arg2[%c6_20] : memref<9xf32, #tpu.memory_space<smem>>
    %38 = vector.broadcast %37 : f32 to vector<1x128xf32>
    %39 = arith.mulf %36, %38 : vector<1x128xf32>
    %40 = arith.addf %34, %39 : vector<1x128xf32>
    %c7 = arith.constant 7 : index
    %c0_21 = arith.constant 0 : index
    %c0_22 = arith.constant 0 : index
    %41 = vector.load %arg1[%c7, %c0_21, %c0_22] : memref<9x1x128xf32, #tpu.memory_space<vmem>>, vector<1x1x128xf32>
    %42 = vector.shape_cast %41 : vector<1x1x128xf32> to vector<1x128xf32>
    %c7_23 = arith.constant 7 : index
    %43 = memref.load %arg2[%c7_23] : memref<9xf32, #tpu.memory_space<smem>>
    %44 = vector.broadcast %43 : f32 to vector<1x128xf32>
    %45 = arith.mulf %42, %44 : vector<1x128xf32>
    %46 = arith.addf %40, %45 : vector<1x128xf32>
    %c8 = arith.constant 8 : index
    %c0_24 = arith.constant 0 : index
    %c0_25 = arith.constant 0 : index
    %47 = vector.load %arg1[%c8, %c0_24, %c0_25] : memref<9x1x128xf32, #tpu.memory_space<vmem>>, vector<1x1x128xf32>
    %48 = vector.shape_cast %47 : vector<1x1x128xf32> to vector<1x128xf32>
    %c8_26 = arith.constant 8 : index
    %49 = memref.load %arg2[%c8_26] : memref<9xf32, #tpu.memory_space<smem>>
    %50 = vector.broadcast %49 : f32 to vector<1x128xf32>
    %51 = arith.mulf %48, %50 : vector<1x128xf32>
    %52 = arith.addf %46, %51 : vector<1x128xf32>
    %c0_27 = arith.constant 0 : index
    %53 = memref.load %arg3[%c0_27] : memref<1xf32, #tpu.memory_space<smem>>
    %cst = arith.constant 9.000000e+00 : f32
    %54 = arith.mulf %53, %cst : f32
    %55 = vector.broadcast %54 : f32 to vector<1x128xf32>
    %56 = arith.addf %52, %55 : vector<1x128xf32>
    %57 = arith.negf %56 : vector<1x128xf32>
    %58 = math.exp %57 : vector<1x128xf32>
    %cst_28 = arith.constant 1.000000e+00 : f32
    %59 = vector.broadcast %cst_28 : f32 to vector<1x128xf32>
    %60 = arith.addf %59, %58 : vector<1x128xf32>
    %61 = arith.divf %59, %60 : vector<1x128xf32>
    %c0_29 = arith.constant 0 : index
    %c0_30 = arith.constant 0 : index
    %62 = vector.load %arg4[%c0_29, %c0_30] : memref<1x128xf32, #tpu.memory_space<vmem>>, vector<1x128xf32>
    tpu.vector_store %arg4[%c0_29, %c0_30], %61 {strides = array<i32>} : memref<1x128xf32, #tpu.memory_space<vmem>>, vector<1x128xf32>,
    return
  }
  func.func @transform_0(%arg0: i32) -> (i32, i32, i32) {
    %c0_i32 = arith.constant 0 : i32
    %c0_i32_0 = arith.constant 0 : i32
    %c0_i32_1 = arith.constant 0 : i32
    return %c0_i32, %arg0, %c0_i32_0 : i32, i32, i32
  }
  func.func @transform_1(%arg0: i32) -> i32 {
    %c0_i32 = arith.constant 0 : i32
    %c0_i32_0 = arith.constant 0 : i32
    return %c0_i32 : i32
  }
  func.func @transform_2(%arg0: i32) -> i32 {
    %c0_i32 = arith.constant 0 : i32
    %c0_i32_0 = arith.constant 0 : i32
    return %c0_i32 : i32
  }
  func.func @transform_3(%arg0: i32) -> (i32, i32) {
    %c0_i32 = arith.constant 0 : i32
    %c0_i32_0 = arith.constant 0 : i32
    return %arg0, %c0_i32 : i32, i32
  }
}

</mosaic_0001>

<bundles_post_ra>
// kernel: logistic_regression.1
= control target key start
LH: loop header
LB: loop body
LE: loop exit
PB: predicated region body
PF: predicated region fallthrough
CT: control target
= control target key end

     0   :  { %9 = vsyncpa [#allocation4], 0  ;;  %s189_s0 = inlined_call_operand.vmem [shape: f32[9,1,128], index: 0, kind: input, shape index: {}]   ;;  %s190_s1 = inlined_call_operand.vmem [shape: f32[9], index: 1, kind: input, shape index: {}]   ;;  %s191_s2 = inlined_call_operand.<no memory space> [shape: f32[1], index: 2, kind: input, shape index: {}]   ;;  %s192_s3 = inlined_call_operand.vmem [shape: f32[1,128], index: 3, kind: output, shape index: {}]  }
   0x1   :  { %s18_s14 = sshll.u32 %s190_s1, 4  ;;  %s19_s14 = int_to_ptr.vmem [resolvable:$true] %s18_s14 }
   0x2   :  { %s118_s15 = scalar_lea.vmem %s19_s14, 16  ;;  %p123_p1 = scmp.lt.s32.totalorder %s19_s14, %s19_s14 }
   0x3   :  { %p119_p0 = scmp.ne.s32.totalorder %s19_s14, %s118_s15  ;;  %p124_p2 = scmp.lt.s32.totalorder %s118_s15, %s118_s15 }
   0x5   :  { %p125_p3 = por %p124_p2, %p123_p1 }
   0x7   :  { %p126_p4 = pnand %p125_p3, %p119_p0 }
   0x9   :  { %129 = shalt.err (!%p126_p4)
}
   0xa   :  { %s132_s16 = smov [#allocation3]  }
   0xb   :  { %21 = dma.vmem_to_smem %s19_s14, 16, %s132_s16, [#allocation4]  }
   0xc   :  { %130 = dma.done.wait [#allocation4], 16  }
   0xd   :  { %131 = vsyncadd [#allocation4], 4294967280 }
   0xe   :  { %27 = sfence }
   0xf   :  { %s29_s17 = sld [smem:[#allocation3]]  ;;  %s97_s18 = sld [smem:[#allocation3 + $0x1]]  ;;  %v28_v0 = vld [vmem:[%s189_s0] sm:$0x1]  ;;  %v96_v1 = vld [vmem:[%s189_s0 + $0x1] sm:$0x1] }
  0x10   :  { %s99_s19 = sld [smem:[#allocation3 + $0x2]]  ;;  %s101_s20 = sld [smem:[#allocation3 + $0x3]]  ;;  %v98_v2 = vld [vmem:[%s189_s0 + $0x2] sm:$0x1]  ;;  %v100_v7 = vld [vmem:[%s189_s0 + $0x3] sm:$0x1] }
  0x11   :  { %s103_s21 = sld [smem:[#allocation3 + $0x4]]  ;;  %s105_s22 = sld [smem:[#allocation3 + $0x5]]  ;;  %v102_v11 = vld [vmem:[%s189_s0 + $0x4] sm:$0x1]  ;;  %v104_v15 = vld [vmem:[%s189_s0 + $0x5] sm:$0x1] }
  0x12   :  { %s107_s28 = sld [smem:[#allocation3 + $0x6]]  ;;  %s109_s4 = sld [smem:[#allocation3 + $0x7]]  ;;  %v106_v19 = vld [vmem:[%s189_s0 + $0x6] sm:$0x1]  ;;  %v108_v23 = vld [vmem:[%s189_s0 + $0x7] sm:$0x1] }
  0x13   :  { %s111_s7 = sld [smem:[#allocation3 + $0x8]]  ;;  %v110_v27 = vld [vmem:[%s189_s0 + $0x8] sm:$0x1] }
  0x15   :  { %v30_v3 = vstv %s29_s17  ;;  %v35_v5 = vstv %s97_s18  ;;  %s81_s18 = smul.f32 9.0, %s191_s2 }
  0x16   :  { %v31_v4 = vmul.f32 %v30_v3, %v28_v0  ;;  %v41_v6 = vstv %s99_s19  ;;  %v36_v8 = vmul.f32 %v96_v1, %v35_v5  ;;  %v47_v10 = vstv %s101_s20 }
  0x17   :  { %v42_v9 = vmul.f32 %v98_v2, %v41_v6  ;;  %v53_v12 = vstv %s103_s21  ;;  %v48_v14 = vmul.f32 %v100_v7, %v47_v10  ;;  %v59_v16 = vstv %s105_s22 }
  0x18   :  { %v37_v13 = vadd.f32 %v36_v8, %v31_v4  ;;  %v54_v18 = vmul.f32 %v102_v11, %v53_v12  ;;  %v65_v20 = vstv %s107_s28  ;;  %v60_v22 = vmul.f32 %v104_v15, %v59_v16 }
  0x19   :  { %v71_v24 = vstv %s109_s4  ;;  %v66_v26 = vmul.f32 %v106_v19, %v65_v20  ;;  %v77_v28 = vstv %s111_s7  ;;  %v82_v34 = vstv %s81_s18 }
  0x1a   :  { %v43_v17 = vadd.f32 %v42_v9, %v37_v13  ;;  %v72_v30 = vmul.f32 %v108_v23, %v71_v24  ;;  %v78_v32 = vmul.f32 %v110_v27, %v77_v28 }
  0x1c   :  { %v49_v21 = vadd.f32 %v48_v14, %v43_v17 }
  0x1e   :  { %v55_v25 = vadd.f32 %v54_v18, %v49_v21 }
  0x20   :  { %v61_v29 = vadd.f32 %v60_v22, %v55_v25 }
  0x22   :  { %v67_v31 = vadd.f32 %v66_v26, %v61_v29 }
  0x24   :  { %v73_v33 = vadd.f32 %v72_v30, %v67_v31 }
  0x26   :  { %v79_v35 = vadd.f32 %v78_v32, %v73_v33 }
  0x28   :  { %v83_v36 = vadd.f32 %v82_v34, %v79_v35 }
  0x2a   :  { %v112_v37 = vmul.f32 -1.442695, %v83_v36 }
  0x2c   :  { %114 = vpow2.f32 %v112_v37 }
  0x36   :  { %v115_v38 = vpop.eup %114 }
  0x37   :  { %v87_v39 = vadd.f32 1.0, %v115_v38 }
  0x39   :  { %116 = vrcp.f32 %v87_v39 }
  0x43   :  { %v117_v40 = vpop.eup %116 }
  0x44   :  { %90 = vst [vmem:[%s192_s3] sm:$0x1] %v117_v40 }
  0x45   :  { %95 = vsyncpa [#allocation4], 1 }

</bundles_post_ra>
